<compile_context>
chip_gen: v6e
topology: v6e:2x2x1
jax: 0.10.0
libtpu: 0.0.40
codegen_flags: <defaults>
</compile_context>

<pallas_src>
import functools

import jax
import jax.numpy as jnp
from jax.experimental import pallas as pl
from jax.experimental.pallas import tpu as pltpu

LANE = 128      # TPU lane width (last-dim padding target for the lane-aligned matmul)
SUBLANE = 8     # f32 sublane granularity (batch-tile alignment)


def _round_up(n: int, m: int) -> int:
    return ((n + m - 1) // m) * m


def mlp_kernel(x_ref, w1_ref, b1_ref, w2_ref, b2_ref, w3_ref, b3_ref, out_ref):
    # Whole 3-layer forward fused per batch tile; all weights resident in VMEM.
    # Dot operands in bf16 (MXU fast path), f32 accumulation, f32 epilogue.
    x = x_ref[...].astype(jnp.bfloat16)

    # Layer 1: Linear(input_dim -> hidden) + ReLU
    h1 = jnp.dot(x, w1_ref[...], preferred_element_type=jnp.float32) + b1_ref[...]
    h1 = jnp.maximum(h1, 0.0)

    # Layer 2: Linear(hidden -> hidden) + ReLU
    h2 = jnp.dot(h1.astype(jnp.bfloat16), w2_ref[...],
                 preferred_element_type=jnp.float32) + b2_ref[...]
    h2 = jnp.maximum(h2, 0.0)

    # Layer 3: Linear(hidden -> 128-padded classes); store only the real class columns
    # so HBM writeback is the unpadded (tile, num_classes) slab.
    logits = jnp.dot(h2.astype(jnp.bfloat16), w3_ref[...],
                     preferred_element_type=jnp.float32) + b3_ref[...]
    out_ref[...] = logits[:, : out_ref.shape[-1]].astype(out_ref.dtype)


def prepare_params(params):
    """One-time conversion of raw f32 params into kernel-ready (bf16, lane-padded) form."""
    hidden, num_classes = params["w3"].shape
    c_pad = _round_up(num_classes, LANE)
    w3p = jnp.zeros((hidden, c_pad), jnp.bfloat16).at[:, :num_classes].set(
        params["w3"].astype(jnp.bfloat16))
    b3p = jnp.zeros((1, c_pad), jnp.float32).at[:, :num_classes].set(
        params["b3"].astype(jnp.float32))
    prepared = {
        "w1": params["w1"].astype(jnp.bfloat16),
        "b1": params["b1"].astype(jnp.float32),
        "w2": params["w2"].astype(jnp.bfloat16),
        "b2": params["b2"].astype(jnp.float32),
        "w3p": w3p,
        "b3p": b3p,
    }
    return prepared, int(num_classes)


@functools.partial(jax.jit, static_argnames=("num_classes", "tile_b", "buffer_depth"))
def mlp_classifier_forward(x, prepared, num_classes, *, tile_b: int = 4096,
                           buffer_depth=None):
    """x: (B, input_dim) f32 or bf16.  prepared: output of prepare_params."""
    w1, b1 = prepared["w1"], prepared["b1"]
    w2, b2 = prepared["w2"], prepared["b2"]
    w3p, b3p = prepared["w3p"], prepared["b3p"]

    B, in_dim = x.shape
    hidden = w1.shape[1]
    c_pad = w3p.shape[1]

    # --- Batch tiling: large 8-aligned tile (amortize per-step overhead), but capped at
    # ~half the batch so grid >= 2 and both v7x TensorCores get work.
    b_al = _round_up(B, SUBLANE)
    half = _round_up((b_al + 1) // 2, SUBLANE)
    eff_tile = max(SUBLANE, min(_round_up(tile_b, SUBLANE), half))
    b_pad = _round_up(B, eff_tile)
    xp = x if b_pad == B else jnp.pad(x, ((0, b_pad - B), (0, 0)))
    grid = (b_pad // eff_tile,)

    # x/out are batch-tiled (pipelined); weights/biases get constant index_maps so they
    # are fetched once and stay VMEM-resident across grid steps.
    def resident(a):
        return pl.BlockSpec(a.shape, lambda i: (0, 0))

    if buffer_depth is not None:
        # Optional deeper pipelining (v5e writeback-hiding sweep knob).
        x_spec = pl.BlockSpec((eff_tile, in_dim), lambda i: (i, 0),
                              pipeline_mode=pl.Buffered(buffer_depth))
        out_spec = pl.BlockSpec((eff_tile, num_classes), lambda i: (i, 0),
                                pipeline_mode=pl.Buffered(buffer_depth))
    else:
        x_spec = pl.BlockSpec((eff_tile, in_dim), lambda i: (i, 0))
        out_spec = pl.BlockSpec((eff_tile, num_classes), lambda i: (i, 0))

    in_specs = [
        x_spec,
        resident(w1), resident(b1),
        resident(w2), resident(b2),
        resident(w3p), resident(b3p),
    ]

    weight_bytes = sum(int(a.size) * a.dtype.itemsize
                       for a in (w1, b1, w2, b2, w3p, b3p))
    nbuf = 2 if buffer_depth is None else int(buffer_depth)
    x_tile_bytes = eff_tile * in_dim * xp.dtype.itemsize
    out_tile_bytes = eff_tile * num_classes * 4
    # Double-buffered x/out tiles + 2x resident weights (still double-buffered by the
    # pipeline) + headroom; clamp to 48 MiB so we stay under v7x's 64 MiB physical VMEM.
    vmem_limit = int(min(nbuf * (x_tile_bytes + out_tile_bytes)
                         + 2 * weight_bytes + (16 << 20),
                         48 << 20))

    flops = 2 * b_pad * (in_dim * hidden + hidden * hidden + hidden * c_pad)
    bytes_accessed = (b_pad * in_dim * xp.dtype.itemsize
                      + b_pad * num_classes * 4
                      + weight_bytes)

    out = pl.pallas_call(
        mlp_kernel,
        out_shape=jax.ShapeDtypeStruct((b_pad, num_classes), jnp.float32),
        grid=grid,
        in_specs=in_specs,
        out_specs=out_spec,
        compiler_params=pltpu.CompilerParams(
            dimension_semantics=("parallel",),
            vmem_limit_bytes=vmem_limit,
        ),
        cost_estimate=pl.CostEstimate(
            flops=int(flops), transcendentals=0, bytes_accessed=int(bytes_accessed)),
    )(xp, w1, b1, w2, b2, w3p, b3p)

    return out[:B]


def init_params(key, input_dim, num_classes, hidden_dim=32):
    """Deterministic init matching PyTorch nn.Linear shapes (weights stored transposed)."""
    ks = jax.random.split(key, 6)

    def linear_init(kw, kb, fan_in, fan_out):
        # PyTorch default: U(-1/sqrt(fan_in), 1/sqrt(fan_in)) for weight and bias.
        bound = 1.0 / jnp.sqrt(fan_in)
        w = jax.random.uniform(kw, (fan_in, fan_out), jnp.float32, -bound, bound)
        b = jax.random.uniform(kb, (1, fan_out), jnp.float32, -bound, bound)
        return w, b

    w1, b1 = linear_init(ks[0], ks[1], input_dim, hidden_dim)
    w2, b2 = linear_init(ks[2], ks[3], hidden_dim, hidden_dim)
    w3, b3 = linear_init(ks[4], ks[5], hidden_dim, num_classes)
    return {"w1": w1, "b1": b1, "w2": w2, "b2": b2, "w3": w3, "b3": b3}


def mlp_reference(x, p):
    h1 = jnp.maximum(x @ p["w1"] + p["b1"], 0.0)
    h2 = jnp.maximum(h1 @ p["w2"] + p["b2"], 0.0)
    return h2 @ p["w3"] + p["b3"]


if __name__ == "__main__":
    key = jax.random.PRNGKey(0)
    k_x, k_p, k_x2 = jax.random.split(key, 3)

    batch, input_dim, hidden_dim, num_classes = 8, 16, 32, 4
    x = jax.random.normal(k_x, (batch, input_dim), jnp.float32)
    params = init_params(k_p, input_dim, num_classes, hidden_dim)
    prepared, nc = prepare_params(params)

    # Small-shape run (single tile).
    out = jax.block_until_ready(mlp_classifier_forward(x, prepared, nc))
    ref = mlp_reference(x, params)
    assert out.shape == (batch, num_classes)
    # bf16 matmul operands (f32 accumulation) -> loosened tolerance vs f32 reference.
    assert jnp.allclose(out, ref, atol=3e-2, rtol=3e-2), float(jnp.max(jnp.abs(out - ref)))

    # Multi-tile / batch-padding / two-core-split path (grid > 1, B % tile != 0).
    x2 = jax.random.normal(k_x2, (1000, input_dim), jnp.float32)
    out2 = jax.block_until_ready(mlp_classifier_forward(x2, prepared, nc, tile_b=256))
    ref2 = mlp_reference(x2, params)
    assert out2.shape == (1000, num_classes)
    assert jnp.allclose(out2, ref2, atol=3e-2, rtol=3e-2), float(jnp.max(jnp.abs(out2 - ref2)))

    print("KERNEL_OK")
</pallas_src>

<mosaic_0001>
module attributes {stable_mosaic.version = 11 : i64} {
  func.func @mlp_kernel(%arg0: i32, %arg1: memref<8x16xf32, #tpu.memory_space<vmem>>, %arg2: memref<16x32xbf16, #tpu.memory_space<vmem>>, %arg3: memref<1x32xf32, #tpu.memory_space<vmem>>, %arg4: memref<32x32xbf16, #tpu.memory_space<vmem>>, %arg5: memref<1x32xf32, #tpu.memory_space<vmem>>, %arg6: memref<32x128xbf16, #tpu.memory_space<vmem>>, %arg7: memref<1x128xf32, #tpu.memory_space<vmem>>, %arg8: memref<8x4xf32, #tpu.memory_space<vmem>>) attributes {dimension_semantics = [#tpu.dimension_semantics<parallel>], iteration_bounds = array<i64: 1>, scalar_prefetch = 0 : i64, scratch_operands = 0 : i64, tpu.core_type = #tpu.core_type<tc>, window_params = [{transform_indices = @transform_0, window_bounds = array<i64: 8, 16>}, {pipeline_mode = #tpu.pipeline_mode<synchronous>, transform_indices = @transform_1, window_bounds = array<i64: 16, 32>}, {pipeline_mode = #tpu.pipeline_mode<synchronous>, transform_indices = @transform_2, window_bounds = array<i64: 1, 32>}, {pipeline_mode = #tpu.pipeline_mode<synchronous>, transform_indices = @transform_3, window_bounds = array<i64: 32, 32>}, {pipeline_mode = #tpu.pipeline_mode<synchronous>, transform_indices = @transform_4, window_bounds = array<i64: 1, 32>}, {pipeline_mode = #tpu.pipeline_mode<synchronous>, transform_indices = @transform_5, window_bounds = array<i64: 32, 128>}, {pipeline_mode = #tpu.pipeline_mode<synchronous>, transform_indices = @transform_6, window_bounds = array<i64: 1, 128>}, {transform_indices = @transform_7, window_bounds = array<i64: 8, 4>}]} {
    %c0 = arith.constant 0 : index
    %c0_0 = arith.constant 0 : index
    %0 = vector.load %arg1[%c0, %c0_0] : memref<8x16xf32, #tpu.memory_space<vmem>>, vector<8x16xf32>
    %1 = arith.truncf %0 : vector<8x16xf32> to vector<8x16xbf16>
    %c0_1 = arith.constant 0 : index
    %c0_2 = arith.constant 0 : index
    %2 = vector.load %arg2[%c0_1, %c0_2] : memref<16x32xbf16, #tpu.memory_space<vmem>>, vector<16x32xbf16>
    %cst = arith.constant dense<0.000000e+00> : vector<8x32xf32>
    %3 = tpu.matmul %1, %2, %cst {dimension_numbers = #tpu.dot_dimension_numbers<[1], [0], [0], [1], [0, 0, 1, 1], [], []>} : vector<8x16xbf16>, vector<16x32xbf16>, vector<8x32xf32> -> vector<8x32xf32>
    %c0_3 = arith.constant 0 : index
    %c0_4 = arith.constant 0 : index
    %4 = vector.load %arg3[%c0_3, %c0_4] : memref<1x32xf32, #tpu.memory_space<vmem>>, vector<1x32xf32>
    %5 = vector.broadcast %4 : vector<1x32xf32> to vector<8x32xf32>
    %6 = arith.addf %3, %5 : vector<8x32xf32>
    %cst_5 = arith.constant 0.000000e+00 : f32
    %7 = vector.broadcast %cst_5 : f32 to vector<8x32xf32>
    %8 = arith.maximumf %6, %7 : vector<8x32xf32>
    %9 = arith.truncf %8 : vector<8x32xf32> to vector<8x32xbf16>
    %c0_6 = arith.constant 0 : index
    %c0_7 = arith.constant 0 : index
    %10 = vector.load %arg4[%c0_6, %c0_7] : memref<32x32xbf16, #tpu.memory_space<vmem>>, vector<32x32xbf16>
    %cst_8 = arith.constant dense<0.000000e+00> : vector<8x32xf32>
    %11 = tpu.matmul %9, %10, %cst_8 {dimension_numbers = #tpu.dot_dimension_numbers<[1], [0], [0], [1], [0, 0, 1, 1], [], []>} : vector<8x32xbf16>, vector<32x32xbf16>, vector<8x32xf32> -> vector<8x32xf32>
    %c0_9 = arith.constant 0 : index
    %c0_10 = arith.constant 0 : index
    %12 = vector.load %arg5[%c0_9, %c0_10] : memref<1x32xf32, #tpu.memory_space<vmem>>, vector<1x32xf32>
    %13 = vector.broadcast %12 : vector<1x32xf32> to vector<8x32xf32>
    %14 = arith.addf %11, %13 : vector<8x32xf32>
    %cst_11 = arith.constant 0.000000e+00 : f32
    %15 = vector.broadcast %cst_11 : f32 to vector<8x32xf32>
    %16 = arith.maximumf %14, %15 : vector<8x32xf32>
    %17 = arith.truncf %16 : vector<8x32xf32> to vector<8x32xbf16>
    %c0_12 = arith.constant 0 : index
    %c0_13 = arith.constant 0 : index
    %18 = vector.load %arg6[%c0_12, %c0_13] : memref<32x128xbf16, #tpu.memory_space<vmem>>, vector<32x128xbf16>
    %cst_14 = arith.constant dense<0.000000e+00> : vector<8x128xf32>
    %19 = tpu.matmul %17, %18, %cst_14 {dimension_numbers = #tpu.dot_dimension_numbers<[1], [0], [0], [1], [0, 0, 1, 1], [], []>} : vector<8x32xbf16>, vector<32x128xbf16>, vector<8x128xf32> -> vector<8x128xf32>
    %c0_15 = arith.constant 0 : index
    %c0_16 = arith.constant 0 : index
    %20 = vector.load %arg7[%c0_15, %c0_16] : memref<1x128xf32, #tpu.memory_space<vmem>>, vector<1x128xf32>
    %21 = vector.broadcast %20 : vector<1x128xf32> to vector<8x128xf32>
    %22 = arith.addf %19, %21 : vector<8x128xf32>
    %23 = vector.extract_strided_slice %22 {offsets = [0, 0], sizes = [8, 4], strides = [1, 1]} : vector<8x128xf32> to vector<8x4xf32>
    %c0_17 = arith.constant 0 : index
    %c0_18 = arith.constant 0 : index
    %24 = vector.load %arg8[%c0_17, %c0_18] : memref<8x4xf32, #tpu.memory_space<vmem>>, vector<8x4xf32>
    tpu.vector_store %arg8[%c0_17, %c0_18], %23 {strides = array<i32>} : memref<8x4xf32, #tpu.memory_space<vmem>>, vector<8x4xf32>,
    return
  }
  func.func @transform_0(%arg0: i32) -> (i32, i32) {
    %c0_i32 = arith.constant 0 : i32
    %c0_i32_0 = arith.constant 0 : i32
    return %arg0, %c0_i32 : i32, i32
  }
  func.func @transform_1(%arg0: i32) -> (i32, i32) {
    %c0_i32 = arith.constant 0 : i32
    %c0_i32_0 = arith.constant 0 : i32
    %c0_i32_1 = arith.constant 0 : i32
    return %c0_i32, %c0_i32_0 : i32, i32
  }
  func.func @transform_2(%arg0: i32) -> (i32, i32) {
    %c0_i32 = arith.constant 0 : i32
    %c0_i32_0 = arith.constant 0 : i32
    %c0_i32_1 = arith.constant 0 : i32
    return %c0_i32, %c0_i32_0 : i32, i32
  }
  func.func @transform_3(%arg0: i32) -> (i32, i32) {
    %c0_i32 = arith.constant 0 : i32
    %c0_i32_0 = arith.constant 0 : i32
    %c0_i32_1 = arith.constant 0 : i32
    return %c0_i32, %c0_i32_0 : i32, i32
  }
  func.func @transform_4(%arg0: i32) -> (i32, i32) {
    %c0_i32 = arith.constant 0 : i32
    %c0_i32_0 = arith.constant 0 : i32
    %c0_i32_1 = arith.constant 0 : i32
    return %c0_i32, %c0_i32_0 : i32, i32
  }
  func.func @transform_5(%arg0: i32) -> (i32, i32) {
    %c0_i32 = arith.constant 0 : i32
    %c0_i32_0 = arith.constant 0 : i32
    %c0_i32_1 = arith.constant 0 : i32
    return %c0_i32, %c0_i32_0 : i32, i32
  }
  func.func @transform_6(%arg0: i32) -> (i32, i32) {
    %c0_i32 = arith.constant 0 : i32
    %c0_i32_0 = arith.constant 0 : i32
    %c0_i32_1 = arith.constant 0 : i32
    return %c0_i32, %c0_i32_0 : i32, i32
  }
  func.func @transform_7(%arg0: i32) -> (i32, i32) {
    %c0_i32 = arith.constant 0 : i32
    %c0_i32_0 = arith.constant 0 : i32
    return %arg0, %c0_i32 : i32, i32
  }
}

</mosaic_0001>

<bundles_post_ra>
// kernel: mlp_classifier_forward.1
= control target key start
LH: loop header
LB: loop body
LE: loop exit
PB: predicated region body
PF: predicated region fallthrough
CT: control target
= control target key end

     0   :  { %12 = vsyncpa [#allocation3], 0  ;;  %s508_s0 = inlined_call_operand.hbm [shape: f32[8,16], index: 0, kind: input, shape index: {}]   ;;  %s509_s1 = inlined_call_operand.hbm [shape: bf16[16,32], index: 1, kind: input, shape index: {}]   ;;  %s510_s2 = inlined_call_operand.vmem [shape: f32[1,32], index: 2, kind: input, shape index: {}]   ;;  %s511_s3 = inlined_call_operand.hbm [shape: bf16[32,32], index: 3, kind: input, shape index: {}]   ;;  %s512_s4 = inlined_call_operand.vmem [shape: f32[1,32], index: 4, kind: input, shape index: {}]   ;;  %s513_s5 = inlined_call_operand.hbm [shape: bf16[32,128], index: 5, kind: input, shape index: {}]   ;;  %s514_s6 = inlined_call_operand.vmem [shape: f32[1,128], index: 6, kind: input, shape index: {}]   ;;  %s515_s7 = inlined_call_operand.vmem [shape: f32[8,4], index: 7, kind: output, shape index: {}]  }
   0x1   :  { %13 = vsyncpa [#allocation5], 0 }
   0x2   :  { %14 = vsyncpa [#allocation8], 0  ;;  %s427_s24 = smov [#allocation4]  }
   0x3   :  { %s30_s25 = sshll.u32 %s427_s24, 4  ;;  %s31_s25 = int_to_ptr.vmem [resolvable:$true] %s30_s25 }
   0x4   :  { %s349_s26 = scalar_lea.vmem %s31_s25, 128  ;;  %p354_p1 = scmp.lt.s32.totalorder %s31_s25, %s31_s25 }
   0x5   :  { %p350_p0 = scmp.ne.s32.totalorder %s31_s25, %s349_s26  ;;  %p355_p2 = scmp.lt.s32.totalorder %s349_s26, %s349_s26 }
   0x7   :  { %p356_p3 = por %p355_p2, %p354_p1 }
   0x9   :  { %p357_p4 = pnand %p356_p3, %p350_p0 }
   0xb   :  { %360 = shalt.err (!%p357_p4)
}
   0xc   :  { %s428_s27 = smov 64   ;;  %s429_s28 = smov 4  }
   0xd   :  { %36 = dma.hbm_to_vmem [thread:$0]  %s509_s1, 128, %s31_s25, [#allocation5], %s428_s27, %s428_s27, %s429_s28  }
   0xe   :  { %s430_s8 = smov [#allocation2]   ;;  %s431_s10 = smov [#allocation6]  }
   0xf   :  { %s21_s9 = sshll.u32 %s430_s8, 4  ;;  %s44_s11 = sshll.u32 %s431_s10, 4  ;;  %s22_s9 = int_to_ptr.vmem [resolvable:$true] %s21_s9  ;;  %s45_s11 = int_to_ptr.vmem [resolvable:$true] %s44_s11 }
  0x10   :  { %s369_s12 = scalar_lea.vmem %s22_s9, 128  ;;  %p374_p6 = scmp.lt.s32.totalorder %s22_s9, %s22_s9 }
  0x11   :  { %p370_p5 = scmp.ne.s32.totalorder %s22_s9, %s369_s12  ;;  %p375_p7 = scmp.lt.s32.totalorder %s369_s12, %s369_s12 }
  0x13   :  { %p376_p8 = por %p375_p7, %p374_p6 }
  0x15   :  { %p377_p9 = pnand %p376_p8, %p370_p5 }
  0x17   :  { %380 = shalt.err (!%p377_p9)
}
  0x18   :  { %24 = dma.hbm_to_vmem [thread:$0]  %s508_s0, 128, %s22_s9, [#allocation3]  }
  0x19   :  { %s389_s15 = scalar_lea.vmem %s45_s11, 256  ;;  %p394_p11 = scmp.lt.s32.totalorder %s45_s11, %s45_s11 }
  0x1a   :  { %p390_p10 = scmp.ne.s32.totalorder %s45_s11, %s389_s15  ;;  %p395_p12 = scmp.lt.s32.totalorder %s389_s15, %s389_s15 }
  0x1c   :  { %p396_p13 = por %p395_p12, %p394_p11 }
  0x1e   :  { %p397_p0 = pnand %p396_p13, %p390_p10 }
  0x20   :  { %400 = shalt.err (!%p397_p0)
}
  0x21   :  { %50 = dma.hbm_to_vmem [thread:$0]  %s511_s3, 256, %s45_s11, [#allocation5], %s428_s27, %s428_s27, %s429_s28  }
  0x22   :  { %s432_s17 = smov [#allocation7]  }
  0x23   :  { %s58_s18 = sshll.u32 %s432_s17, 4  ;;  %s59_s18 = int_to_ptr.vmem [resolvable:$true] %s58_s18 }
  0x24   :  { %s409_s19 = scalar_lea.vmem %s59_s18, 256  ;;  %p414_p2 = scmp.lt.s32.totalorder %s59_s18, %s59_s18 }
  0x25   :  { %p410_p1 = scmp.ne.s32.totalorder %s59_s18, %s409_s19  ;;  %p415_p3 = scmp.lt.s32.totalorder %s409_s19, %s409_s19 }
  0x27   :  { %p416_p4 = por %p415_p3, %p414_p2 }
  0x29   :  { %p417_p5 = pnand %p416_p4, %p410_p1 }
  0x2b   :  { %420 = shalt.err (!%p417_p5)
}
  0x2c   :  { %64 = dma.hbm_to_vmem [thread:$0]  %s513_s5, 256, %s59_s18, [#allocation8], %s428_s27, %s428_s27, %s429_s28  }
  0x2d   :  { %421 = dma.done.wait [#allocation3], 128  }
  0x2e   :  { %422 = vsyncadd [#allocation3], 4294967168 }
  0x2f   :  { %423 = dma.done.wait [#allocation5], 384  }
  0x30   :  { %424 = vsyncadd [#allocation5], 4294966912 }
  0x31   :  { %425 = dma.done.wait [#allocation8], 256  }
  0x32   :  { %426 = vsyncadd [#allocation8], 4294967040  ;;  %v433_v0 = vmov 0.0   ;;  %vm434_vm0 = vmmov 0   ;;  %v336_v1 = vld [vmem:[#allocation4] sm:$0xff]   ;;  %v80_v2 = vld [vmem:[#allocation2] sm:$0xff] }
  0x33   :  { %306 = vmatprep.subr.bf16.mxu0 %v433_v0  ;;  %308 = vmatprep.mubr.msk.bf16.mxu0 %vm434_vm0, %v433_v0  ;;  %vm97_vm1 = vcmask 130048   ;;  %v81_v3 = vpack.c.bf16 %v80_v2, %v80_v2  ;;  %v337_v4 = vld [vmem:[#allocation6 + $0x8] sm:$0xff]   ;;  %v338_v5 = vld [vmem:[#allocation6] sm:$0xff]   ;;  %v339_v6 = vld [vmem:[#allocation7 + $0x8] sm:$0xff]   ;;  %vm166_vm2 = vcmask 261120   ;;  %vm278_vm3 = vcmask 31744  }
  0x34   :  { %312 = vmatprep.subr.bf16.mxu1 %v433_v0  ;;  %316 = vmatprep.mubr.msk.bf16.mxu1 %vm434_vm0, %v433_v0  ;;  %v287_v7 = vld [vmem:[%s510_s2] ss:$0 sm:$0xff] }
  0x35   :  { %307 = vmatpush3.bf16.msra.mxu0 %v336_v1  ;;  %313 = vmatpush3.bf16.msra.mxu1 %v337_v4  ;;  %v340_v15 = vld [vmem:[#allocation7] sm:$0xff]  }
  0x36   :  { %320 = vmatprep.subr.bf16.mxu0 %v433_v0  ;;  %314 = vmatprep.subr.bf16.mxu1 %v433_v0  ;;  %v290_v16 = vld [vmem:[%s512_s4] ss:$0 sm:$0xff] }
  0x37   :  { %v294_v24 = vld [vmem:[%s514_s6] ss:$0 sm:$0xff] }
  0x38   :  { %309 = vmatmul.mubr.msk.bf16.vlgmr.msra.gmra.mxu0 %vm97_vm1, %v81_v3 }
  0x39   :  { %324 = vmatprep.mubr.msk.bf16.mxu0 %vm434_vm0, %v433_v0  ;;  %315 = vmatpush3.bf16.msra.mxu1 %v338_v5 }
  0x3a   :  { %321 = vmatpush3.bf16.msra.mxu0 %v339_v6 }
  0x3b   :  { %322 = vmatprep.subr.bf16.mxu0 %v433_v0 }
  0x3e   :  { %323 = vmatpush3.bf16.msra.mxu0 %v340_v15 }
  0xf8   :  { %v135_v8 = vpop.f32.mrf.mxu0 }
  0xf9   :  { %v136_v9 = vadd.f32 %v287_v7, %v135_v8 }
  0xfa   :  { %v310_v10 = vpop.f32.mrf.mxu0 }
  0xfb   :  { %v141_v11 = vmax.f32 %v136_v9, 0.0 }
  0xfc   :  { %v138_v12 = vpop.f32.mrf.mxu0 }
  0xfd   :  { %v142_v13 = vpack.c.bf16 %v141_v11, %v141_v11 }
  0xfe   :  { %v311_v14 = vpop.f32.mrf.mxu0 }
  0xff   :  { %317 = vmatmul.mubr.msk.bf16.vlgmr.msra.gmra.mxu1 %vm166_vm2, %v142_v13 }
 0x1bf   :  { %v204_v17 = vpop.f32.mrf.mxu1 }
 0x1c0   :  { %v205_v18 = vadd.f32 %v290_v16, %v204_v17 }
 0x1c1   :  { %v318_v19 = vpop.f32.mrf.mxu1 }
 0x1c2   :  { %v210_v20 = vmax.f32 %v205_v18, 0.0 }
 0x1c3   :  { %v207_v21 = vpop.f32.mrf.mxu1 }
 0x1c4   :  { %v211_v22 = vpack.c.bf16 %v210_v20, %v210_v20 }
 0x1c5   :  { %v319_v23 = vpop.f32.mrf.mxu1 }
 0x1c6   :  { %325 = vmatmul.mubr.msk.bf16.vlgmr.msra.gmra.mxu0 %vm166_vm2, %v211_v22 }
 0x286   :  { %v272_v25 = vpop.f32.mrf.mxu0 }
 0x287   :  { %v273_v26 = vadd.f32 %v294_v24, %v272_v25 }
 0x288   :  { %v326_v27 = vpop.f32.mrf.mxu0 }
 0x289   :  { %279 = vst.msk [vmem:[%s515_s7] sm:$0xff] %vm278_vm3, %v273_v26 }
 0x28a   :  { %v275_v28 = vpop.f32.mrf.mxu0 }
 0x28c   :  { %v327_v29 = vpop.f32.mrf.mxu0 }
 0x28d   :  { %284 = vsyncpa [#allocation3], 1 }
 0x28e   :  { %285 = vsyncpa [#allocation5], 1 }
 0x28f   :  { %286 = vsyncpa [#allocation8], 1 }

</bundles_post_ra>
